<compile_context>
chip_gen: v7x
topology: tpu7x:2x2x1
jax: 0.10.0
libtpu: 0.0.40
codegen_flags: <defaults>
</compile_context>

<pallas_src>
import functools

import jax
import jax.numpy as jnp
from jax.experimental import pallas as pl
from jax.experimental.pallas import tpu as pltpu


TILE_N = 128          # rows per grid step in the MLP kernel
DEFAULT_TILE_O = 512  # output-feature tile (lane-dense, streams W2)
GATHER_ROWS = 8       # rows gathered per grid step (full sublane stores)


def _round_up(x, m):
    return (x + m - 1) // m * m


# ----------------------------------------------------------------------------
# Pallas kernels
# ----------------------------------------------------------------------------
def _mlp_kernel(x_ref, w1_ref, b1_ref, w2_ref, b2_ref, o_ref, h_scratch):
    """Grid = (row_tiles i, out_tiles j); j is the inner (arbitrary) axis.

    h = tanh(x @ W1 + b1) is computed once per row tile (j == 0) into a VMEM
    scratch (bf16) and reused while W2/b2 tiles stream over j.
    """
    @pl.when(pl.program_id(1) == 0)
    def _():
        h = jnp.dot(x_ref[...], w1_ref[...], preferred_element_type=jnp.float32)
        h_scratch[...] = jnp.tanh(h + b1_ref[...]).astype(h_scratch.dtype)

    y = jnp.dot(h_scratch[...], w2_ref[...], preferred_element_type=jnp.float32)
    o_ref[...] = (y + b2_ref[...]).astype(o_ref.dtype)


def _gather_kernel(idx_ref, emb_hbm, o_ref, sem, *, rows_per_step, vocab):
    """Embedding row gather: DMA only the needed rows from HBM directly into
    the (rows_per_step, out_dim) output VMEM block."""
    base = pl.program_id(0) * rows_per_step
    copies = []
    for r in range(rows_per_step):            # static unroll
        row = idx_ref[base + r]
        row = jnp.minimum(jnp.maximum(row, 0), vocab - 1)   # bounds clamp
        cp = pltpu.make_async_copy(
            emb_hbm.at[pl.ds(row, 1), :],
            o_ref.at[pl.ds(r, 1), :],
            sem.at[r])
        cp.start()
        copies.append(cp)
    for cp in copies:
        cp.wait()


# ----------------------------------------------------------------------------
# Wrappers
# ----------------------------------------------------------------------------
def prefix_mlp_pallas(x, w1, b1, w2, b2, *, tile_n=TILE_N, tile_o=DEFAULT_TILE_O):
    """x: (N, H) f32 -> (N, O) f32.  Matmuls run in bf16 with f32 accumulation.

    Rows are padded to a multiple of tile_n; output features are padded to a
    multiple of 128 and streamed in tile_o-wide tiles.
    """
    n, h = x.shape
    ph, o = w2.shape

    n_pad = _round_up(n, tile_n)
    o_pad = _round_up(o, 128)
    tile_o = min(tile_o, o_pad)
    if o_pad % tile_o != 0:
        tile_o = 128  # 128 always divides o_pad

    # bf16 matmul operands; biases stay f32 (added after f32 accumulation).
    x_p = jnp.zeros((n_pad, h), jnp.bfloat16).at[:n, :].set(x.astype(jnp.bfloat16))
    w1_b = w1.astype(jnp.bfloat16)
    w2_p = jnp.zeros((ph, o_pad), jnp.bfloat16).at[:, :o].set(w2.astype(jnp.bfloat16))
    b1_2d = b1.reshape(1, ph).astype(jnp.float32)
    b2_2d = jnp.zeros((1, o_pad), jnp.float32).at[:, :o].set(
        b2.reshape(1, o).astype(jnp.float32))

    grid = (n_pad // tile_n, o_pad // tile_o)

    out = pl.pallas_call(
        _mlp_kernel,
        out_shape=jax.ShapeDtypeStruct((n_pad, o_pad), jnp.float32),
        grid_spec=pltpu.PrefetchScalarGridSpec(
            num_scalar_prefetch=0,
            grid=grid,
            in_specs=[
                pl.BlockSpec((tile_n, h), lambda i, j: (i, 0)),   # x (re-used over j)
                pl.BlockSpec((h, ph), lambda i, j: (0, 0)),       # W1 resident
                pl.BlockSpec((1, ph), lambda i, j: (0, 0)),       # b1 resident
                pl.BlockSpec((ph, tile_o), lambda i, j: (0, j)),  # W2 streamed over j
                pl.BlockSpec((1, tile_o), lambda i, j: (0, j)),   # b2 streamed over j
            ],
            out_specs=pl.BlockSpec((tile_n, tile_o), lambda i, j: (i, j)),
            scratch_shapes=[pltpu.VMEM((tile_n, ph), jnp.bfloat16)],  # cached h
        ),
        compiler_params=pltpu.CompilerParams(
            dimension_semantics=("parallel", "arbitrary"),
            vmem_limit_bytes=48 * 1024 * 1024,
        ),
    )(x_p, w1_b, b1_2d, w2_p, b2_2d)

    return out[:n, :o]


def embedding_gather_pallas(prefix_flat, emb_table, *, rows_per_step=GATHER_ROWS):
    """prefix_flat: (N,) int32 indices; emb_table: (V, O) -> (N, O).

    The table stays in HBM; only the selected rows are DMA'd (8 per step)
    straight into the output VMEM block.
    """
    n = prefix_flat.shape[0]
    v, o = emb_table.shape

    n_pad = _round_up(n, rows_per_step)
    idx = jnp.zeros((n_pad,), jnp.int32).at[:n].set(prefix_flat.astype(jnp.int32))

    out = pl.pallas_call(
        functools.partial(_gather_kernel, rows_per_step=rows_per_step, vocab=v),
        out_shape=jax.ShapeDtypeStruct((n_pad, o), emb_table.dtype),
        grid_spec=pltpu.PrefetchScalarGridSpec(
            num_scalar_prefetch=1,                       # indices land in SMEM
            grid=(n_pad // rows_per_step,),
            in_specs=[pl.BlockSpec(memory_space=pl.ANY)],  # table stays in HBM
            out_specs=pl.BlockSpec((rows_per_step, o), lambda i, idx: (i, 0)),
            scratch_shapes=[pltpu.SemaphoreType.DMA((rows_per_step,))],
        ),
        compiler_params=pltpu.CompilerParams(
            dimension_semantics=("arbitrary",),
        ),
    )(idx, emb_table)

    return out[:n]


class PrefixEncoderPallas:
    """JAX/Pallas re-implementation of the PyTorch PrefixEncoder."""

    def __init__(self, *, pre_seq_len, hidden_size, prefix_hidden_size,
                 num_hidden_layers, prefix_projection, key):
        self.prefix_projection = prefix_projection
        self.out_dim = num_hidden_layers * 2 * hidden_size
        ks = jax.random.split(key, 5)
        if prefix_projection:
            self.embedding = jax.random.normal(
                ks[0], (pre_seq_len, hidden_size), jnp.float32) * 0.02
            self.w1 = jax.random.normal(
                ks[1], (hidden_size, prefix_hidden_size), jnp.float32) * 0.02
            self.b1 = jax.random.normal(ks[2], (prefix_hidden_size,), jnp.float32) * 0.02
            self.w2 = jax.random.normal(
                ks[3], (prefix_hidden_size, self.out_dim), jnp.float32) * 0.02
            self.b2 = jax.random.normal(ks[4], (self.out_dim,), jnp.float32) * 0.02
        else:
            self.embedding = jax.random.normal(
                ks[0], (pre_seq_len, self.out_dim), jnp.float32) * 0.02

    def __call__(self, prefix):
        b, p = prefix.shape
        flat = prefix.reshape(-1).astype(jnp.int32)
        if self.prefix_projection:
            # Embedding lookup is cheap glue; the MLP (matmul/tanh/matmul) is
            # the hot path and runs inside the Pallas kernel.
            x = jnp.take(self.embedding, flat, axis=0)           # (N, H)
            y = prefix_mlp_pallas(x, self.w1, self.b1, self.w2, self.b2)
        else:
            # The whole forward is the gather -> do it in Pallas.
            y = embedding_gather_pallas(flat, self.embedding)
        return y.reshape(b, p, self.out_dim)

    # Pure-JAX reference (f32 everywhere) for verification.
    def reference(self, prefix):
        b, p = prefix.shape
        flat = prefix.reshape(-1).astype(jnp.int32)
        x = jnp.take(self.embedding, flat, axis=0)
        if self.prefix_projection:
            h = jnp.tanh(x @ self.w1 + self.b1)
            x = h @ self.w2 + self.b2
        return x.reshape(b, p, -1)


if __name__ == "__main__":
    # Small config consistent with the module's forward.
    batch = 2
    pre_seq_len = 8          # also the prefix length fed to the encoder
    hidden_size = 32
    prefix_hidden_size = 64
    num_hidden_layers = 2    # => out_dim = 2 * 2 * 32 = 128

    key = jax.random.PRNGKey(0)
    k_params, k_params2 = jax.random.split(key)

    # prefix indices: (batch, prefix_len), values in [0, pre_seq_len)
    prefix = jnp.tile(jnp.arange(pre_seq_len, dtype=jnp.int32)[None, :], (batch, 1))

    # --- prefix_projection = True (embedding -> Linear/Tanh/Linear MLP) ---
    enc_proj = PrefixEncoderPallas(
        pre_seq_len=pre_seq_len, hidden_size=hidden_size,
        prefix_hidden_size=prefix_hidden_size,
        num_hidden_layers=num_hidden_layers,
        prefix_projection=True, key=k_params)
    out_proj = jax.block_until_ready(enc_proj(prefix))
    ref_proj = enc_proj.reference(prefix)
    assert out_proj.shape == (batch, pre_seq_len, 2 * num_hidden_layers * hidden_size)
    # bf16 matmul operands vs f32 reference -> loosened tolerance.
    assert jnp.allclose(out_proj, ref_proj, atol=1e-3, rtol=2e-2), (
        float(jnp.max(jnp.abs(out_proj - ref_proj))))

    # --- prefix_projection = False (pure embedding lookup) ---
    enc_emb = PrefixEncoderPallas(
        pre_seq_len=pre_seq_len, hidden_size=hidden_size,
        prefix_hidden_size=prefix_hidden_size,
        num_hidden_layers=num_hidden_layers,
        prefix_projection=False, key=k_params2)
    out_emb = jax.block_until_ready(enc_emb(prefix))
    ref_emb = enc_emb.reference(prefix)
    assert out_emb.shape == (batch, pre_seq_len, 2 * num_hidden_layers * hidden_size)
    assert jnp.allclose(out_emb, ref_emb, atol=1e-6, rtol=1e-6)

    print("KERNEL_OK")
</pallas_src>

<mosaic_0001>
module attributes {stable_mosaic.version = 11 : i64} {
  func.func @_mlp_kernel(%arg0: i32, %arg1: i32, %arg2: memref<128x32xbf16, #tpu.memory_space<vmem>>, %arg3: memref<32x64xbf16, #tpu.memory_space<vmem>>, %arg4: memref<1x64xf32, #tpu.memory_space<vmem>>, %arg5: memref<64x128xbf16, #tpu.memory_space<vmem>>, %arg6: memref<1x128xf32, #tpu.memory_space<vmem>>, %arg7: memref<128x128xf32, #tpu.memory_space<vmem>>, %arg8: memref<128x64xbf16, #tpu.memory_space<vmem>>) attributes {dimension_semantics = [#tpu.dimension_semantics<parallel>, #tpu.dimension_semantics<arbitrary>], iteration_bounds = array<i64: 1, 1>, scalar_prefetch = 0 : i64, scratch_operands = 1 : i64, tpu.core_type = #tpu.core_type<tc>, window_params = [{transform_indices = @transform_0, window_bounds = array<i64: 128, 32>}, {pipeline_mode = #tpu.pipeline_mode<synchronous>, transform_indices = @transform_1, window_bounds = array<i64: 32, 64>}, {pipeline_mode = #tpu.pipeline_mode<synchronous>, transform_indices = @transform_2, window_bounds = array<i64: 1, 64>}, {transform_indices = @transform_3, window_bounds = array<i64: 64, 128>}, {transform_indices = @transform_4, window_bounds = array<i64: 1, 128>}, {transform_indices = @transform_5, window_bounds = array<i64: 128, 128>}]} {
    %c0_i32 = arith.constant 0 : i32
    %0 = arith.cmpi eq, %arg1, %c0_i32 : i32
    %1 = arith.extui %0 : i1 to i32
    %c0_i32_0 = arith.constant 0 : i32
    %2 = arith.cmpi ne, %1, %c0_i32_0 : i32
    scf.if %2 {
      %c0_8 = arith.constant 0 : index
      %c0_9 = arith.constant 0 : index
      %10 = vector.load %arg2[%c0_8, %c0_9] : memref<128x32xbf16, #tpu.memory_space<vmem>>, vector<128x32xbf16>
      %c0_10 = arith.constant 0 : index
      %c0_11 = arith.constant 0 : index
      %11 = vector.load %arg3[%c0_10, %c0_11] : memref<32x64xbf16, #tpu.memory_space<vmem>>, vector<32x64xbf16>
      %cst_12 = arith.constant dense<0.000000e+00> : vector<128x64xf32>
      %12 = tpu.matmul %10, %11, %cst_12 {dimension_numbers = #tpu.dot_dimension_numbers<[1], [0], [0], [1], [0, 0, 1, 1], [], []>} : vector<128x32xbf16>, vector<32x64xbf16>, vector<128x64xf32> -> vector<128x64xf32>
      %c0_13 = arith.constant 0 : index
      %c0_14 = arith.constant 0 : index
      %13 = vector.load %arg4[%c0_13, %c0_14] : memref<1x64xf32, #tpu.memory_space<vmem>>, vector<1x64xf32>
      %14 = vector.broadcast %13 : vector<1x64xf32> to vector<128x64xf32>
      %15 = arith.addf %12, %14 : vector<128x64xf32>
      %16 = math.tanh %15 : vector<128x64xf32>
      %17 = arith.truncf %16 : vector<128x64xf32> to vector<128x64xbf16>
      %c0_15 = arith.constant 0 : index
      %c0_16 = arith.constant 0 : index
      %18 = vector.load %arg8[%c0_15, %c0_16] : memref<128x64xbf16, #tpu.memory_space<vmem>>, vector<128x64xbf16>
      tpu.vector_store %arg8[%c0_15, %c0_16], %17 {strides = array<i32>} : memref<128x64xbf16, #tpu.memory_space<vmem>>, vector<128x64xbf16>,
    } else {
    }
    %c0 = arith.constant 0 : index
    %c0_1 = arith.constant 0 : index
    %3 = vector.load %arg8[%c0, %c0_1] : memref<128x64xbf16, #tpu.memory_space<vmem>>, vector<128x64xbf16>
    %c0_2 = arith.constant 0 : index
    %c0_3 = arith.constant 0 : index
    %4 = vector.load %arg5[%c0_2, %c0_3] : memref<64x128xbf16, #tpu.memory_space<vmem>>, vector<64x128xbf16>
    %cst = arith.constant dense<0.000000e+00> : vector<128x128xf32>
    %5 = tpu.matmul %3, %4, %cst {dimension_numbers = #tpu.dot_dimension_numbers<[1], [0], [0], [1], [0, 0, 1, 1], [], []>} : vector<128x64xbf16>, vector<64x128xbf16>, vector<128x128xf32> -> vector<128x128xf32>
    %c0_4 = arith.constant 0 : index
    %c0_5 = arith.constant 0 : index
    %6 = vector.load %arg6[%c0_4, %c0_5] : memref<1x128xf32, #tpu.memory_space<vmem>>, vector<1x128xf32>
    %7 = vector.broadcast %6 : vector<1x128xf32> to vector<128x128xf32>
    %8 = arith.addf %5, %7 : vector<128x128xf32>
    %c0_6 = arith.constant 0 : index
    %c0_7 = arith.constant 0 : index
    %9 = vector.load %arg7[%c0_6, %c0_7] : memref<128x128xf32, #tpu.memory_space<vmem>>, vector<128x128xf32>
    tpu.vector_store %arg7[%c0_6, %c0_7], %8 {strides = array<i32>} : memref<128x128xf32, #tpu.memory_space<vmem>>, vector<128x128xf32>,
    return
  }
  func.func @transform_0(%arg0: i32, %arg1: i32) -> (i32, i32) {
    %c0_i32 = arith.constant 0 : i32
    %c0_i32_0 = arith.constant 0 : i32
    return %arg0, %c0_i32 : i32, i32
  }
  func.func @transform_1(%arg0: i32, %arg1: i32) -> (i32, i32) {
    %c0_i32 = arith.constant 0 : i32
    %c0_i32_0 = arith.constant 0 : i32
    %c0_i32_1 = arith.constant 0 : i32
    return %c0_i32, %c0_i32_0 : i32, i32
  }
  func.func @transform_2(%arg0: i32, %arg1: i32) -> (i32, i32) {
    %c0_i32 = arith.constant 0 : i32
    %c0_i32_0 = arith.constant 0 : i32
    %c0_i32_1 = arith.constant 0 : i32
    return %c0_i32, %c0_i32_0 : i32, i32
  }
  func.func @transform_3(%arg0: i32, %arg1: i32) -> (i32, i32) {
    %c0_i32 = arith.constant 0 : i32
    %c0_i32_0 = arith.constant 0 : i32
    return %c0_i32, %arg1 : i32, i32
  }
  func.func @transform_4(%arg0: i32, %arg1: i32) -> (i32, i32) {
    %c0_i32 = arith.constant 0 : i32
    %c0_i32_0 = arith.constant 0 : i32
    return %c0_i32, %arg1 : i32, i32
  }
  func.func @transform_5(%arg0: i32, %arg1: i32) -> (i32, i32) {
    %c0_i32 = arith.constant 0 : i32
    return %arg0, %arg1 : i32, i32
  }
}

</mosaic_0001>

<bundles_post_ra>
// kernel: tpu_custom_call.1
= control target key start
LH: loop header
LB: loop body
LE: loop exit
PB: predicated region body
PF: predicated region fallthrough
CT: control target
= control target key end

     0   :  { %vm105_vm0 = vcmask 261120   ;;  %s767_s0 = inlined_call_operand.vmem [shape: bf16[128,32], index: 0, kind: input, shape index: {}]   ;;  %s768_s1 = inlined_call_operand.vmem [shape: bf16[32,64], index: 1, kind: input, shape index: {}]   ;;  %s769_s2 = inlined_call_operand.vmem [shape: f32[1,64], index: 2, kind: input, shape index: {}]   ;;  %s770_s3 = inlined_call_operand.vmem [shape: bf16[64,128], index: 3, kind: input, shape index: {}]   ;;  %s771_s4 = inlined_call_operand.vmem [shape: f32[1,128], index: 4, kind: input, shape index: {}]   ;;  %s772_s5 = inlined_call_operand.hbm [shape: f32[128,128], index: 5, kind: output, shape index: {}]  }
   0x1   :  { %v562_v0 = vld [vmem:[%s768_s1] sm:$0xff]   ;;  %v563_v1 = vld [vmem:[%s768_s1 + $0x8] sm:$0xff]   ;;  %v566_v4 = vld [vmem:[%s767_s0 + $0x10] sm:$0xff]  }
   0x2   :  { %515 = vmatprep.subr.bf16.mxu0 %v562_v0  ;;  %v564_v2 = vld [vmem:[%s767_s0] sm:$0xff]   ;;  %v565_v3 = vld [vmem:[%s767_s0 + $0x8] sm:$0xff]  }
   0x3   :  { %516 = vmatpush3.bf16.msra.mxu0 %v562_v0  ;;  %519 = vmatprep.mubr.msk.bf16.mxu0 %vm105_vm0, %v564_v2 }
   0x4   :  { %517 = vmatprep.subr.bf16.mxu0 %v563_v1 }
   0x7   :  { %518 = vmatpush3.bf16.msra.mxu0 %v563_v1 }
   0xa   :  { %520 = vmatmul.mubr.msk.bf16.vlgmr.msra.gmra.mrb[0].mxu0 %vm105_vm0, %v565_v3 }
   0xb   :  { %523 = vmatprep.mubr.msk.bf16.mxu0 %vm105_vm0, %v566_v4 }
   0xc   :  { %10 = vsyncpa [#allocation4], 0  ;;  %v567_v5 = vld [vmem:[%s767_s0 + $0x18] sm:$0xff]   ;;  %v568_v6 = vld [vmem:[%s767_s0 + $0x20] sm:$0xff]   ;;  %vm251_vm1 = vcmask 523264  }
   0xd   :  { %v569_v7 = vld [vmem:[%s767_s0 + $0x28] sm:$0xff]   ;;  %v570_v8 = vld [vmem:[%s767_s0 + $0x30] sm:$0xff]   ;;  %v571_v9 = vld [vmem:[%s767_s0 + $0x38] sm:$0xff]  }
   0xe   :  { %v572_v10 = vld [vmem:[%s770_s3] sm:$0xff]   ;;  %v573_v11 = vld [vmem:[%s770_s3 + $0x8] sm:$0xff]   ;;  %v574_v12 = vld [vmem:[%s770_s3 + $0x10] sm:$0xff]  }
   0xf   :  { %535 = vmatprep.subr.bf16.mxu1 %v572_v10  ;;  %v575_v13 = vld [vmem:[%s770_s3 + $0x18] sm:$0xff]   ;;  %v718_v14 = vld [vmem:[%s769_s2] ss:$0 sm:$0xff] }
  0x10   :  { %536 = vmatpush3.bf16.msra.mxu1 %v572_v10 }
  0x11   :  { %537 = vmatprep.subr.bf16.mxu1 %v573_v11 }
  0x12   :  { %524 = vmatmul.mubr.msk.bf16.gmra.mrb[4].mxu0 %vm105_vm0, %v567_v5 }
  0x13   :  { %527 = vmatprep.mubr.msk.bf16.mxu0 %vm105_vm0, %v568_v6 }
  0x14   :  { %538 = vmatpush3.bf16.msra.mxu1 %v573_v11 }
  0x15   :  { %539 = vmatprep.subr.bf16.mxu1 %v574_v12 }
  0x18   :  { %540 = vmatpush3.bf16.msra.mxu1 %v574_v12 }
  0x19   :  { %541 = vmatprep.subr.bf16.mxu1 %v575_v13 }
  0x1a   :  { %528 = vmatmul.mubr.msk.bf16.gmra.mrb[8].mxu0 %vm105_vm0, %v569_v7 }
  0x1b   :  { %531 = vmatprep.mubr.msk.bf16.mxu0 %vm105_vm0, %v570_v8 }
  0x1c   :  { %542 = vmatpush3.bf16.msra.mxu1 %v575_v13 }
  0x22   :  { %532 = vmatmul.mubr.msk.bf16.gmra.mrb[12].mxu0 %vm105_vm0, %v571_v9 }
  0xdd   :  { %v521_v15 = vpop.f32.mrb[0].mxu0 }
  0xde   :  { %v173_v16 = vadd.f32 %v521_v15, %v718_v14  ;;  %v164_v17 = vpop.f32.mrb[1].mxu0  ;;  %v480_v15 = vld [vmem:[%s771_s4] ss:$0 sm:$0xff]  ;;  %s632_s4 = smov [#allocation3]  }
  0xdf   :  { %v165_v18 = vadd.f32 %v718_v14, %v164_v17  ;;  %v522_v19 = vpop.f32.mrb[2].mxu0  ;;  %s450_s21 = sshll.u32 %s632_s4, 4  ;;  %s451_s21 = int_to_ptr.vmem [resolvable:$true] %s450_s21 }
  0xe0   :  { %576 = vtanh.f32 %v173_v16  ;;  %v176_v20 = vadd.f32 %v522_v19, %v718_v14  ;;  %v167_v21 = vpop.f32.mrb[3].mxu0  ;;  %s608_s22 = scalar_lea.vmem %s451_s21, 2048  ;;  %p613_p1 = scmp.lt.s32.totalorder %s451_s21, %s451_s21 }
  0xe1   :  { %578 = vtanh.f32 %v165_v18  ;;  %v168_v22 = vadd.f32 %v718_v14, %v167_v21  ;;  %p609_p0 = scmp.ne.s32.totalorder %s451_s21, %s608_s22  ;;  %p614_p2 = scmp.lt.s32.totalorder %s608_s22, %s608_s22 }
  0xe2   :  { %580 = vtanh.f32 %v176_v20 }
  0xe3   :  { %582 = vtanh.f32 %v168_v22  ;;  %p615_p3 = por %p614_p2, %p613_p1 }
  0xe5   :  { %v525_v23 = vpop.f32.mrb[4].mxu0  ;;  %p616_p4 = pnand %p615_p3, %p609_p0 }
  0xe6   :  { %v189_v24 = vadd.f32 %v525_v23, %v718_v14  ;;  %v180_v25 = vpop.f32.mrb[5].mxu0 }
  0xe7   :  { %v181_v26 = vadd.f32 %v718_v14, %v180_v25  ;;  %v526_v27 = vpop.f32.mrb[6].mxu0 }
  0xe8   :  { %584 = vtanh.f32 %v189_v24  ;;  %v192_v28 = vadd.f32 %v526_v27, %v718_v14  ;;  %v183_v29 = vpop.f32.mrb[7].mxu0 }
  0xe9   :  { %586 = vtanh.f32 %v181_v26  ;;  %v184_v30 = vadd.f32 %v718_v14, %v183_v29 }
  0xea   :  { %v577_v31 = vpop.eup %576  ;;  %588 = vtanh.f32 %v192_v28 }
  0xeb   :  { %v579_v32 = vpop.eup %578  ;;  %590 = vtanh.f32 %v184_v30 }
  0xec   :  { %v581_v33 = vpop.eup %580 }
  0xed   :  { %v583_v34 = vpop.eup %582  ;;  %v244_v35 = vpack.c.bf16 %v581_v33, %v577_v31  ;;  %v529_v36 = vpop.f32.mrb[8].mxu0 }
  0xee   :  { %v243_v37 = vpack.c.bf16 %v583_v34, %v579_v32  ;;  %v205_v38 = vadd.f32 %v529_v36, %v718_v14  ;;  %v196_v39 = vpop.f32.mrb[9].mxu0 }
  0xef   :  { %253 = vst.msk [vmem:[#allocation2 + $0x8] sm:$0xff] %vm251_vm1, %v244_v35  ;;  %v197_v40 = vadd.f32 %v718_v14, %v196_v39  ;;  %v530_v41 = vpop.f32.mrb[10].mxu0 }
  0xf0   :  { %252 = vst.msk [vmem:[#allocation2] sm:$0xff] %vm251_vm1, %v243_v37  ;;  %592 = vtanh.f32 %v205_v38  ;;  %v208_v42 = vadd.f32 %v530_v41, %v718_v14  ;;  %v199_v43 = vpop.f32.mrb[11].mxu0 }
  0xf1   :  { %594 = vtanh.f32 %v197_v40  ;;  %v200_v44 = vadd.f32 %v718_v14, %v199_v43 }
  0xf2   :  { %v585_v45 = vpop.eup %584  ;;  %596 = vtanh.f32 %v208_v42 }
  0xf3   :  { %v587_v46 = vpop.eup %586  ;;  %598 = vtanh.f32 %v200_v44 }
  0xf4   :  { %v589_v47 = vpop.eup %588 }
  0xf5   :  { %v591_v48 = vpop.eup %590  ;;  %v246_v49 = vpack.c.bf16 %v589_v47, %v585_v45  ;;  %v533_v50 = vpop.f32.mrb[12].mxu0 }
  0xf6   :  { %v245_v51 = vpack.c.bf16 %v591_v48, %v587_v46  ;;  %v221_v52 = vadd.f32 %v533_v50, %v718_v14  ;;  %v212_v53 = vpop.f32.mrb[13].mxu0  ;;  %v261_v59 = vld [vmem:[#allocation2 + $0x8] sm:$0xff] }
  0xf7   :  { %255 = vst.msk [vmem:[#allocation2 + $0x18] sm:$0xff] %vm251_vm1, %v246_v49  ;;  %v213_v54 = vadd.f32 %v718_v14, %v212_v53  ;;  %v534_v55 = vpop.f32.mrb[14].mxu0  ;;  %v260_v56 = vld [vmem:[#allocation2] sm:$0xff] }
  0xf8   :  { %254 = vst.msk [vmem:[#allocation2 + $0x10] sm:$0xff] %vm251_vm1, %v245_v51  ;;  %600 = vtanh.f32 %v221_v52  ;;  %v224_v57 = vadd.f32 %v534_v55, %v718_v14  ;;  %v215_v58 = vpop.f32.mrb[15].mxu0  ;;  %543 = vmatprep.mubr.msk.bf16.mxu1 %vm251_vm1, %v260_v56 }
  0xf9   :  { %602 = vtanh.f32 %v213_v54  ;;  %v216_v60 = vadd.f32 %v718_v14, %v215_v58  ;;  %544 = vmatmul.mubr.msk.bf16.vlgmr.msra.gmra.mrb[0].mxu1 %vm251_vm1, %v261_v59 }
  0xfa   :  { %v593_v61 = vpop.eup %592  ;;  %604 = vtanh.f32 %v224_v57 }
  0xfb   :  { %v595_v62 = vpop.eup %594  ;;  %606 = vtanh.f32 %v216_v60 }
  0xfc   :  { %v597_v63 = vpop.eup %596 }
  0xfd   :  { %v599_v0 = vpop.eup %598  ;;  %v248_v1 = vpack.c.bf16 %v597_v63, %v593_v61 }
  0xfe   :  { %v247_v2 = vpack.c.bf16 %v599_v0, %v595_v62  ;;  %v263_v4 = vld [vmem:[#allocation2 + $0x18] sm:$0xff] }
  0xff   :  { %257 = vst.msk [vmem:[#allocation2 + $0x28] sm:$0xff] %vm251_vm1, %v248_v1  ;;  %v262_v3 = vld [vmem:[#allocation2 + $0x10] sm:$0xff] }
 0x100   :  { %256 = vst.msk [vmem:[#allocation2 + $0x20] sm:$0xff] %vm251_vm1, %v247_v2  ;;  %547 = vmatprep.mubr.msk.bf16.mxu1 %vm251_vm1, %v262_v3 }
 0x101   :  { %548 = vmatmul.mubr.msk.bf16.gmra.mrb[4].mxu1 %vm251_vm1, %v263_v4 }
 0x102   :  { %v601_v5 = vpop.eup %600 }
 0x103   :  { %v603_v6 = vpop.eup %602 }
 0x104   :  { %v605_v7 = vpop.eup %604 }
 0x105   :  { %v607_v8 = vpop.eup %606  ;;  %v250_v9 = vpack.c.bf16 %v605_v7, %v601_v5 }
 0x106   :  { %v249_v10 = vpack.c.bf16 %v607_v8, %v603_v6  ;;  %v265_v12 = vld [vmem:[#allocation2 + $0x28] sm:$0xff] }
 0x107   :  { %259 = vst.msk [vmem:[#allocation2 + $0x38] sm:$0xff] %vm251_vm1, %v250_v9  ;;  %v264_v11 = vld [vmem:[#allocation2 + $0x20] sm:$0xff] }
 0x108   :  { %258 = vst.msk [vmem:[#allocation2 + $0x30] sm:$0xff] %vm251_vm1, %v249_v10  ;;  %551 = vmatprep.mubr.msk.bf16.mxu1 %vm251_vm1, %v264_v11 }
 0x109   :  { %552 = vmatmul.mubr.msk.bf16.gmra.mrb[8].mxu1 %vm251_vm1, %v265_v12 }
 0x10e   :  { %v267_v14 = vld [vmem:[#allocation2 + $0x38] sm:$0xff] }
 0x10f   :  { %v266_v13 = vld [vmem:[#allocation2 + $0x30] sm:$0xff] }
 0x110   :  { %555 = vmatprep.mubr.msk.bf16.mxu1 %vm251_vm1, %v266_v13 }
 0x111   :  { %556 = vmatmul.mubr.msk.bf16.gmra.mrb[12].mxu1 %vm251_vm1, %v267_v14 }
 0x1cc   :  { %v545_v16 = vpop.f32.mrb[0].mxu1 }
 0x1cd   :  { %v375_v17 = vadd.f32 %v545_v16, %v480_v15  ;;  %v366_v18 = vpop.f32.mrb[1].mxu1 }
 0x1ce   :  { %v367_v19 = vadd.f32 %v480_v15, %v366_v18  ;;  %v546_v20 = vpop.f32.mrb[2].mxu1 }
 0x1cf   :  { %431 = vst [vmem:[#allocation3 + $0x10] sm:$0xff] %v375_v17  ;;  %v378_v21 = vadd.f32 %v546_v20, %v480_v15  ;;  %v369_v22 = vpop.f32.mrb[3].mxu1 }
 0x1d0   :  { %429 = vst [vmem:[#allocation3] sm:$0xff] %v367_v19  ;;  %v370_v23 = vadd.f32 %v480_v15, %v369_v22 }
 0x1d1   :  { %432 = vst [vmem:[#allocation3 + $0x18] sm:$0xff] %v378_v21 }
 0x1d2   :  { %430 = vst [vmem:[#allocation3 + $0x8] sm:$0xff] %v370_v23 }
 0x1d4   :  { %v549_v24 = vpop.f32.mrb[4].mxu1 }
 0x1d5   :  { %v391_v25 = vadd.f32 %v549_v24, %v480_v15  ;;  %v382_v26 = vpop.f32.mrb[5].mxu1 }
 0x1d6   :  { %v383_v27 = vadd.f32 %v480_v15, %v382_v26  ;;  %v550_v28 = vpop.f32.mrb[6].mxu1 }
 0x1d7   :  { %435 = vst [vmem:[#allocation3 + $0x30] sm:$0xff] %v391_v25  ;;  %v394_v29 = vadd.f32 %v550_v28, %v480_v15  ;;  %v385_v30 = vpop.f32.mrb[7].mxu1 }
 0x1d8   :  { %433 = vst [vmem:[#allocation3 + $0x20] sm:$0xff] %v383_v27  ;;  %v386_v31 = vadd.f32 %v480_v15, %v385_v30 }
 0x1d9   :  { %436 = vst [vmem:[#allocation3 + $0x38] sm:$0xff] %v394_v29 }
 0x1da   :  { %434 = vst [vmem:[#allocation3 + $0x28] sm:$0xff] %v386_v31 }
 0x1dc   :  { %v553_v32 = vpop.f32.mrb[8].mxu1 }
 0x1dd   :  { %v407_v33 = vadd.f32 %v553_v32, %v480_v15  ;;  %v398_v34 = vpop.f32.mrb[9].mxu1 }
 0x1de   :  { %v399_v35 = vadd.f32 %v480_v15, %v398_v34  ;;  %v554_v36 = vpop.f32.mrb[10].mxu1 }
 0x1df   :  { %439 = vst [vmem:[#allocation3 + $0x50] sm:$0xff] %v407_v33  ;;  %v410_v37 = vadd.f32 %v554_v36, %v480_v15  ;;  %v401_v38 = vpop.f32.mrb[11].mxu1 }
 0x1e0   :  { %437 = vst [vmem:[#allocation3 + $0x40] sm:$0xff] %v399_v35  ;;  %v402_v39 = vadd.f32 %v480_v15, %v401_v38 }
 0x1e1   :  { %440 = vst [vmem:[#allocation3 + $0x58] sm:$0xff] %v410_v37 }
 0x1e2   :  { %438 = vst [vmem:[#allocation3 + $0x48] sm:$0xff] %v402_v39 }
 0x1e4   :  { %v557_v40 = vpop.f32.mrb[12].mxu1 }
 0x1e5   :  { %v423_v41 = vadd.f32 %v557_v40, %v480_v15  ;;  %v414_v42 = vpop.f32.mrb[13].mxu1 }
 0x1e6   :  { %v415_v43 = vadd.f32 %v480_v15, %v414_v42  ;;  %v558_v44 = vpop.f32.mrb[14].mxu1 }
 0x1e7   :  { %443 = vst [vmem:[#allocation3 + $0x70] sm:$0xff] %v423_v41  ;;  %v426_v45 = vadd.f32 %v558_v44, %v480_v15  ;;  %v417_v46 = vpop.f32.mrb[15].mxu1 }
 0x1e8   :  { %441 = vst [vmem:[#allocation3 + $0x60] sm:$0xff] %v415_v43  ;;  %v418_v47 = vadd.f32 %v480_v15, %v417_v46 }
 0x1e9   :  { %444 = vst [vmem:[#allocation3 + $0x78] sm:$0xff] %v426_v45 }
 0x1ea   :  { %442 = vst [vmem:[#allocation3 + $0x68] sm:$0xff] %v418_v47 }
 0x1eb   :  { %619 = shalt.err (!%p616_p4)
}
 0x1ec   :  { %s620_s25 = scalar_lea.hbm %s772_s5, 2048 }
 0x1ed   :  { %p621_p5 = scmp.ne.s32.totalorder %s772_s5, %s620_s25  ;;  %p624_p6 = scmp.lt.u32.totalorder %s620_s25, %s772_s5 }
 0x1ef   :  { %p626_p7 = pnand %p624_p6, %p621_p5 }
 0x1f1   :  { %629 = shalt.err (!%p626_p7)
}
 0x1f2   :  { %s633_s29 = smov 128   ;;  %s634_s30 = smov 8  }
 0x1f3   :  { %456 = dma.vmem_to_hbm [thread:$0]  %s451_s21, 2048, %s772_s5, [#allocation4], %s633_s29, %s633_s29, %s634_s30  }
 0x1f4   :  { %630 = dma.done.wait [#allocation4], 2048  }
 0x1f5   :  { %631 = vsyncadd [#allocation4], 4294965248 }
 0x1f6   :  { %460 = vsyncpa [#allocation4], 1 }

</bundles_post_ra>
